<compile_context>
chip_gen: v7x
topology: tpu7x:2x2x1
jax: 0.10.0
libtpu: 0.0.40
codegen_flags: <defaults>
</compile_context>

<pallas_src>
import jax
import jax.numpy as jnp
from jax import lax
from jax.experimental import pallas as pl
from jax.experimental.pallas import tpu as pltpu


def critic_kernel(state_ref, action_ref, w1s_ref, w1a_ref, b1_ref,
                  w2_ref, b2_ref, wq_ref, bq_ref, q_ref):
    # fc1 as a split-K matmul (replaces torch.cat([state, action], dim=1)).
    h1 = jnp.dot(state_ref[...], w1s_ref[...], preferred_element_type=jnp.float32)
    h1 = h1 + jnp.dot(action_ref[...], w1a_ref[...], preferred_element_type=jnp.float32)
    h1 = jnp.maximum(h1 + b1_ref[...], 0.0)

    # fc2: bf16 MXU inputs, f32 accumulation, f32 epilogue (bias + ReLU).
    h2 = jnp.dot(h1.astype(jnp.bfloat16), w2_ref[...],
                 preferred_element_type=jnp.float32)
    h2 = jnp.maximum(h2 + b2_ref[...], 0.0)

    # q head: wq (1, fc2) contracted with h2 (TILE_M, fc2) along fc2 gives a
    # lane-dense (1, TILE_M) row (same trans_b pattern as q @ k^T in attention).
    q_row = lax.dot_general(wq_ref[...], h2.astype(jnp.bfloat16),
                            (((1,), (1,)), ((), ())),
                            preferred_element_type=jnp.float32)
    q_ref[...] = (q_row + bq_ref[...]).astype(q_ref.dtype)


def init_critic_params(key, input_dims, n_agents, n_actions, fc1_dims, fc2_dims):
    """PyTorch-Linear-style uniform(+-1/sqrt(fan_in)) init, laid out for the kernel."""
    in0 = input_dims + n_agents * n_actions
    ks = jax.random.split(key, 6)

    def unif(k, shape, fan_in):
        bound = 1.0 / (fan_in ** 0.5)
        return jax.random.uniform(k, shape, jnp.float32, -bound, bound)

    w1 = unif(ks[0], (in0, fc1_dims), in0)          # (in, out) = fc1.weight.T
    b1 = unif(ks[1], (1, fc1_dims), in0)
    w2 = unif(ks[2], (fc1_dims, fc2_dims), fc1_dims)
    b2 = unif(ks[3], (1, fc2_dims), fc1_dims)
    wq = unif(ks[4], (1, fc2_dims), fc2_dims)       # q.weight is (1, fc2) in torch
    bq = unif(ks[5], (1, 1), fc2_dims)

    # Split fc1's weight so the kernel never needs the concatenated input;
    # MXU operands are stored in bf16 (accumulation stays f32 on the MXU).
    w1s = w1[:input_dims].astype(jnp.bfloat16)      # state rows
    w1a = w1[input_dims:].astype(jnp.bfloat16)      # action rows
    w2 = w2.astype(jnp.bfloat16)
    wq = wq.astype(jnp.bfloat16)
    return (w1s, w1a, b1, w2, b2, wq, bq)


def critic_forward(state, action, params, *, tile_m=128):
    w1s, w1a, b1, w2, b2, wq, bq = params
    batch, input_dims = state.shape
    act_dims = action.shape[1]
    fc1_dims = w1s.shape[1]
    fc2_dims = w2.shape[1]

    # bf16 activation stream halves input DMA bytes; MXU accumulates in f32.
    state = state.astype(jnp.bfloat16)
    action = action.astype(jnp.bfloat16)

    num_tiles = pl.cdiv(batch, tile_m)
    padded = num_tiles * tile_m
    if padded != batch:  # pad the ragged tail tile; extra rows are dropped below
        state = jnp.pad(state, ((0, padded - batch), (0, 0)))
        action = jnp.pad(action, ((0, padded - batch), (0, 0)))

    q_rows = pl.pallas_call(
        critic_kernel,
        out_shape=jax.ShapeDtypeStruct((1, padded), jnp.float32),
        grid=(num_tiles,),
        in_specs=[
            pl.BlockSpec((tile_m, input_dims), lambda i: (i, 0)),    # state tile
            pl.BlockSpec((tile_m, act_dims), lambda i: (i, 0)),      # action tile
            pl.BlockSpec((input_dims, fc1_dims), lambda i: (0, 0)),  # resident weights
            pl.BlockSpec((act_dims, fc1_dims), lambda i: (0, 0)),
            pl.BlockSpec((1, fc1_dims), lambda i: (0, 0)),
            pl.BlockSpec((fc1_dims, fc2_dims), lambda i: (0, 0)),
            pl.BlockSpec((1, fc2_dims), lambda i: (0, 0)),
            pl.BlockSpec((1, fc2_dims), lambda i: (0, 0)),
            pl.BlockSpec((1, 1), lambda i: (0, 0)),
        ],
        out_specs=pl.BlockSpec((1, tile_m), lambda i: (0, i)),       # lane-dense rows
        compiler_params=pltpu.CompilerParams(
            dimension_semantics=("parallel",),
            vmem_limit_bytes=32 * 1024 * 1024,
        ),
    )(state, action, w1s, w1a, b1, w2, b2, wq, bq)

    # TODO(synk): for MADDPG, fuse all n_agents (and target) critics into one
    # call with stacked weights to amortize launch overhead and fill the MXU.

    # (1, padded) lane-dense slab -> PyTorch-shaped (batch, 1).
    return q_rows.reshape(padded, 1)[:batch]


if __name__ == "__main__":
    # Small, module-consistent shapes; batch is a non-multiple of the 128-row
    # tile so both the multi-tile grid and the padding path are exercised.
    batch = 200
    input_dims = 32      # centralized state dim
    n_agents = 3
    n_actions = 4        # -> action width 12, fc1 contraction K = 32 + 12 = 44
    fc1_dims = 64
    fc2_dims = 64

    key = jax.random.PRNGKey(0)
    k_state, k_action, k_params = jax.random.split(key, 3)
    state = jax.random.normal(k_state, (batch, input_dims), jnp.float32)
    action = jax.random.normal(k_action, (batch, n_agents * n_actions), jnp.float32)
    params = init_critic_params(k_params, input_dims, n_agents, n_actions,
                                fc1_dims, fc2_dims)

    q = jax.block_until_ready(critic_forward(state, action, params))

    # Pure-JAX reference with the same bf16 cast points (bf16 MXU, f32 accum).
    w1s, w1a, b1, w2, b2, wq, bq = params
    xs = state.astype(jnp.bfloat16)
    xa = action.astype(jnp.bfloat16)
    h1 = (jnp.dot(xs, w1s, preferred_element_type=jnp.float32)
          + jnp.dot(xa, w1a, preferred_element_type=jnp.float32) + b1)
    h1 = jnp.maximum(h1, 0.0)
    h2 = jnp.dot(h1.astype(jnp.bfloat16), w2, preferred_element_type=jnp.float32) + b2
    h2 = jnp.maximum(h2, 0.0)
    ref = jnp.dot(h2.astype(jnp.bfloat16), wq.T, preferred_element_type=jnp.float32) + bq

    assert q.shape == (batch, 1)
    assert jnp.allclose(q, ref, atol=2e-3, rtol=2e-3), float(jnp.max(jnp.abs(q - ref)))

    print("KERNEL_OK")
</pallas_src>

<mosaic_0001>
module attributes {stable_mosaic.version = 11 : i64} {
  func.func @critic_kernel(%arg0: i32, %arg1: memref<128x32xbf16, #tpu.memory_space<vmem>>, %arg2: memref<128x12xbf16, #tpu.memory_space<vmem>>, %arg3: memref<32x64xbf16, #tpu.memory_space<vmem>>, %arg4: memref<12x64xbf16, #tpu.memory_space<vmem>>, %arg5: memref<1x64xf32, #tpu.memory_space<vmem>>, %arg6: memref<64x64xbf16, #tpu.memory_space<vmem>>, %arg7: memref<1x64xf32, #tpu.memory_space<vmem>>, %arg8: memref<1x64xbf16, #tpu.memory_space<vmem>>, %arg9: memref<1x1xf32, #tpu.memory_space<vmem>>, %arg10: memref<1x128xf32, #tpu.memory_space<vmem>>) attributes {dimension_semantics = [#tpu.dimension_semantics<parallel>], iteration_bounds = array<i64: 2>, scalar_prefetch = 0 : i64, scratch_operands = 0 : i64, tpu.core_type = #tpu.core_type<tc>, window_params = [{transform_indices = @transform_0, window_bounds = array<i64: 128, 32>}, {transform_indices = @transform_1, window_bounds = array<i64: 128, 12>}, {pipeline_mode = #tpu.pipeline_mode<synchronous>, transform_indices = @transform_2, window_bounds = array<i64: 32, 64>}, {pipeline_mode = #tpu.pipeline_mode<synchronous>, transform_indices = @transform_3, window_bounds = array<i64: 12, 64>}, {pipeline_mode = #tpu.pipeline_mode<synchronous>, transform_indices = @transform_4, window_bounds = array<i64: 1, 64>}, {pipeline_mode = #tpu.pipeline_mode<synchronous>, transform_indices = @transform_5, window_bounds = array<i64: 64, 64>}, {pipeline_mode = #tpu.pipeline_mode<synchronous>, transform_indices = @transform_6, window_bounds = array<i64: 1, 64>}, {pipeline_mode = #tpu.pipeline_mode<synchronous>, transform_indices = @transform_7, window_bounds = array<i64: 1, 64>}, {pipeline_mode = #tpu.pipeline_mode<synchronous>, transform_indices = @transform_8, window_bounds = array<i64: 1, 1>}, {transform_indices = @transform_9, window_bounds = array<i64: 1, 128>}]} {
    %c0 = arith.constant 0 : index
    %c0_0 = arith.constant 0 : index
    %0 = vector.load %arg1[%c0, %c0_0] : memref<128x32xbf16, #tpu.memory_space<vmem>>, vector<128x32xbf16>
    %c0_1 = arith.constant 0 : index
    %c0_2 = arith.constant 0 : index
    %1 = vector.load %arg3[%c0_1, %c0_2] : memref<32x64xbf16, #tpu.memory_space<vmem>>, vector<32x64xbf16>
    %cst = arith.constant dense<0.000000e+00> : vector<128x64xf32>
    %2 = tpu.matmul %0, %1, %cst {dimension_numbers = #tpu.dot_dimension_numbers<[1], [0], [0], [1], [0, 0, 1, 1], [], []>} : vector<128x32xbf16>, vector<32x64xbf16>, vector<128x64xf32> -> vector<128x64xf32>
    %c0_3 = arith.constant 0 : index
    %c0_4 = arith.constant 0 : index
    %3 = vector.load %arg2[%c0_3, %c0_4] : memref<128x12xbf16, #tpu.memory_space<vmem>>, vector<128x12xbf16>
    %c0_5 = arith.constant 0 : index
    %c0_6 = arith.constant 0 : index
    %4 = vector.load %arg4[%c0_5, %c0_6] : memref<12x64xbf16, #tpu.memory_space<vmem>>, vector<12x64xbf16>
    %cst_7 = arith.constant dense<0.000000e+00> : vector<128x64xf32>
    %5 = tpu.matmul %3, %4, %cst_7 {dimension_numbers = #tpu.dot_dimension_numbers<[1], [0], [0], [1], [0, 0, 1, 1], [], []>} : vector<128x12xbf16>, vector<12x64xbf16>, vector<128x64xf32> -> vector<128x64xf32>
    %6 = arith.addf %2, %5 : vector<128x64xf32>
    %c0_8 = arith.constant 0 : index
    %c0_9 = arith.constant 0 : index
    %7 = vector.load %arg5[%c0_8, %c0_9] : memref<1x64xf32, #tpu.memory_space<vmem>>, vector<1x64xf32>
    %8 = vector.broadcast %7 : vector<1x64xf32> to vector<128x64xf32>
    %9 = arith.addf %6, %8 : vector<128x64xf32>
    %cst_10 = arith.constant 0.000000e+00 : f32
    %10 = vector.broadcast %cst_10 : f32 to vector<128x64xf32>
    %11 = arith.maximumf %9, %10 : vector<128x64xf32>
    %12 = arith.truncf %11 : vector<128x64xf32> to vector<128x64xbf16>
    %c0_11 = arith.constant 0 : index
    %c0_12 = arith.constant 0 : index
    %13 = vector.load %arg6[%c0_11, %c0_12] : memref<64x64xbf16, #tpu.memory_space<vmem>>, vector<64x64xbf16>
    %cst_13 = arith.constant dense<0.000000e+00> : vector<128x64xf32>
    %14 = tpu.matmul %12, %13, %cst_13 {dimension_numbers = #tpu.dot_dimension_numbers<[1], [0], [0], [1], [0, 0, 1, 1], [], []>} : vector<128x64xbf16>, vector<64x64xbf16>, vector<128x64xf32> -> vector<128x64xf32>
    %c0_14 = arith.constant 0 : index
    %c0_15 = arith.constant 0 : index
    %15 = vector.load %arg7[%c0_14, %c0_15] : memref<1x64xf32, #tpu.memory_space<vmem>>, vector<1x64xf32>
    %16 = vector.broadcast %15 : vector<1x64xf32> to vector<128x64xf32>
    %17 = arith.addf %14, %16 : vector<128x64xf32>
    %cst_16 = arith.constant 0.000000e+00 : f32
    %18 = vector.broadcast %cst_16 : f32 to vector<128x64xf32>
    %19 = arith.maximumf %17, %18 : vector<128x64xf32>
    %c0_17 = arith.constant 0 : index
    %c0_18 = arith.constant 0 : index
    %20 = vector.load %arg8[%c0_17, %c0_18] : memref<1x64xbf16, #tpu.memory_space<vmem>>, vector<1x64xbf16>
    %21 = arith.truncf %19 : vector<128x64xf32> to vector<128x64xbf16>
    %cst_19 = arith.constant dense<0.000000e+00> : vector<1x128xf32>
    %22 = tpu.matmul %20, %21, %cst_19 {dimension_numbers = #tpu.dot_dimension_numbers<[1], [1], [0], [0], [0, 0, 1, 0], [], []>} : vector<1x64xbf16>, vector<128x64xbf16>, vector<1x128xf32> -> vector<1x128xf32>
    %c0_20 = arith.constant 0 : index
    %c0_21 = arith.constant 0 : index
    %23 = vector.load %arg9[%c0_20, %c0_21] : memref<1x1xf32, #tpu.memory_space<vmem>>, vector<1x1xf32>
    %24 = vector.broadcast %23 : vector<1x1xf32> to vector<1x128xf32>
    %25 = arith.addf %22, %24 : vector<1x128xf32>
    %c0_22 = arith.constant 0 : index
    %c0_23 = arith.constant 0 : index
    %26 = vector.load %arg10[%c0_22, %c0_23] : memref<1x128xf32, #tpu.memory_space<vmem>>, vector<1x128xf32>
    tpu.vector_store %arg10[%c0_22, %c0_23], %25 {strides = array<i32>} : memref<1x128xf32, #tpu.memory_space<vmem>>, vector<1x128xf32>,
    return
  }
  func.func @transform_0(%arg0: i32) -> (i32, i32) {
    %c0_i32 = arith.constant 0 : i32
    %c0_i32_0 = arith.constant 0 : i32
    return %arg0, %c0_i32 : i32, i32
  }
  func.func @transform_1(%arg0: i32) -> (i32, i32) {
    %c0_i32 = arith.constant 0 : i32
    %c0_i32_0 = arith.constant 0 : i32
    return %arg0, %c0_i32 : i32, i32
  }
  func.func @transform_2(%arg0: i32) -> (i32, i32) {
    %c0_i32 = arith.constant 0 : i32
    %c0_i32_0 = arith.constant 0 : i32
    %c0_i32_1 = arith.constant 0 : i32
    return %c0_i32, %c0_i32_0 : i32, i32
  }
  func.func @transform_3(%arg0: i32) -> (i32, i32) {
    %c0_i32 = arith.constant 0 : i32
    %c0_i32_0 = arith.constant 0 : i32
    %c0_i32_1 = arith.constant 0 : i32
    return %c0_i32, %c0_i32_0 : i32, i32
  }
  func.func @transform_4(%arg0: i32) -> (i32, i32) {
    %c0_i32 = arith.constant 0 : i32
    %c0_i32_0 = arith.constant 0 : i32
    %c0_i32_1 = arith.constant 0 : i32
    return %c0_i32, %c0_i32_0 : i32, i32
  }
  func.func @transform_5(%arg0: i32) -> (i32, i32) {
    %c0_i32 = arith.constant 0 : i32
    %c0_i32_0 = arith.constant 0 : i32
    %c0_i32_1 = arith.constant 0 : i32
    return %c0_i32, %c0_i32_0 : i32, i32
  }
  func.func @transform_6(%arg0: i32) -> (i32, i32) {
    %c0_i32 = arith.constant 0 : i32
    %c0_i32_0 = arith.constant 0 : i32
    %c0_i32_1 = arith.constant 0 : i32
    return %c0_i32, %c0_i32_0 : i32, i32
  }
  func.func @transform_7(%arg0: i32) -> (i32, i32) {
    %c0_i32 = arith.constant 0 : i32
    %c0_i32_0 = arith.constant 0 : i32
    %c0_i32_1 = arith.constant 0 : i32
    return %c0_i32, %c0_i32_0 : i32, i32
  }
  func.func @transform_8(%arg0: i32) -> (i32, i32) {
    %c0_i32 = arith.constant 0 : i32
    %c0_i32_0 = arith.constant 0 : i32
    %c0_i32_1 = arith.constant 0 : i32
    return %c0_i32, %c0_i32_0 : i32, i32
  }
  func.func @transform_9(%arg0: i32) -> (i32, i32) {
    %c0_i32 = arith.constant 0 : i32
    %c0_i32_0 = arith.constant 0 : i32
    return %c0_i32, %arg0 : i32, i32
  }
}

</mosaic_0001>

<bundles_post_ra>
// kernel: tpu_custom_call.1
= control target key start
LH: loop header
LB: loop body
LE: loop exit
PB: predicated region body
PF: predicated region fallthrough
CT: control target
= control target key end

     0   :  { %s1692_s0 = inlined_call_operand.vmem [shape: bf16[256,32], index: 0, kind: input, shape index: {}]   ;;  %s1693_s1 = inlined_call_operand.vmem [shape: bf16[256,12], index: 1, kind: input, shape index: {}]   ;;  %s1694_s2 = inlined_call_operand.vmem [shape: bf16[32,64], index: 2, kind: input, shape index: {}]   ;;  %s1695_s3 = inlined_call_operand.vmem [shape: bf16[12,64], index: 3, kind: input, shape index: {}]   ;;  %s1696_s4 = inlined_call_operand.vmem [shape: f32[1,64], index: 4, kind: input, shape index: {}]   ;;  %s1697_s5 = inlined_call_operand.vmem [shape: bf16[64,64], index: 5, kind: input, shape index: {}]   ;;  %s1698_s6 = inlined_call_operand.vmem [shape: f32[1,64], index: 6, kind: input, shape index: {}]   ;;  %s1699_s7 = inlined_call_operand.vmem [shape: bf16[1,64], index: 7, kind: input, shape index: {}]   ;;  %s1700_s8 = inlined_call_operand.<no memory space> [shape: f32[1,1], index: 8, kind: input, shape index: {}]   ;;  %s1701_s9 = inlined_call_operand.hbm [shape: f32[1,256], index: 9, kind: output, shape index: {}]  }
   0x1   :  { %v14_v0 = vstv %s1700_s8 }
   0x2   :  { %15 = vst [vmem:[#allocation2] sm:$0x1] %v14_v0 }
   0x3   :  { %16 = vsyncpa [#allocation4], 0 }
   0x4   :  { %18 = vsyncpa [#allocation4 + $0x1], 0  ;;  %s1518_s11 = smov 0   ;;  %s1520_s12 = smov 0  }
   0x5   :  { %s1522_s13 = smov 0   ;;  %s1524_s14 = smov 0  }
   0x6 LB: > { %s1130_s8 = sadd.s32 4294967295, %s1459_s14   ;;  %s1131_s15 = sadd.s32 4294967294, %s1459_s14   ;;  %s1459_s14 = sphi %s1524_s14, %s1707_s14   ;;  %s1455_s13 = sphi %s1522_s13, %s1706_s13   ;;  %s1451_s12 = sphi %s1520_s12, %s1705_s12   ;;  %s1447_s11 = sphi %s1518_s11, %s1704_s11  }
   0x7   : > { %s1541_s16 = sadd.s32 1, %s1459_s14   ;;  %s230_s17 = sadd.s32 1, %s1455_s13 }
   0x8   : > { %s227_s18 = ssub.s32 %s1459_s14, %s1541_s16  ;;  %p240_p0 = scmp.ne.s32.totalorder %s1455_s13, %s1451_s12 }
   0x9   : > { %p228_p1 = scmp.eq.s32.totalorder %s227_s18, 0  ;;  %p241_p2 = scmp.eq.s32.totalorder %s1130_s8, 1 }
   0xa   : > { %p246_p3 = scmp.ne.s32.totalorder %s1451_s12, %s1447_s11  ;;  %p247_p4 = scmp.eq.s32.totalorder %s1131_s15, 1 }
   0xb   : > { %s1551_s19 = scalar_select %p228_p1, %s1455_s13, %s230_s17  }
   0xc   : > { %p1553_p5 = por %p241_p2, %p240_p0  ;;  %p1557_p6 = por %p247_p4, %p246_p3 }
   0xd   : > { %p1134_p7 = scmp.ge.s32.totalorder %s1459_s14, 1  ;;  %p304_p8 = scmp.lt.s32.totalorder %s1459_s14, 3 }
   0xf   : > { %p305_p9 = pnand %p1134_p7, %p304_p8 }
  0x10   : > { %v1374_v1 = vld [vmem:[%s1695_s3] sm:$0x3f] (!%p305_p9)   ;;  %vm465_vm0 = vcmask (!%p305_p9), 1045504   ;;  %s1566_s24 = sshll.u32 (!%p305_p9), %s1130_s8, 4  ;;  %v1394_v5 = vld [vmem:[%s1697_s5 + $0x8] sm:$0xff] (!%p305_p9)   ;;  %vm440_vm1 = vcmask (!%p305_p9), 97280  }
  0x11   : > { %308 = sbr.rel (%p305_p9) target bundleno = 797 (0x31d), region = 56  ;;  %v1376_v2 = vld [vmem:[%s1694_s2] sm:$0xff] (!%p305_p9)   ;;  %1330 = vmatprep.subr.msk.bf16.mxu0 (!%p305_p9), %vm465_vm0, %v1374_v1  ;;  %v467_v3 = vsel (!%p305_p9), %vm465_vm0, %v1374_v1, 0  ;;  %p345_p10 = scmp.lt.s32.totalorder (!%p305_p9), %s1566_s24, 31  ;;  %v1381_v6 = vld [vmem:[%s1694_s2 + $0x8] sm:$0xff] (!%p305_p9)   ;;  %vm618_vm2 = vcmask (!%p305_p9), 261120  }
  0x12   : > { %1233 = vmatpush3.bf16.msra.mxu0 (!%p305_p9), %v467_v3  ;;  %v1393_v4 = vld [vmem:[%s1697_s5] sm:$0xff] (!%p305_p9)   ;;  %v1395_v23 = vld [vmem:[%s1697_s5 + $0x10] sm:$0xff] (!%p305_p9)   ;;  %v1396_v24 = vld [vmem:[%s1697_s5 + $0x18] sm:$0xff] (!%p305_p9)   ;;  %vm826_vm3 = vcmask (!%p305_p9), 523264   ;;  %vm1462_vm4 = vmmov (!%p305_p9), 0   ;;  %s342_s25 = sand.u32 (!%p305_p9), 1, %s1451_s12   ;;  %s1650_s30 = scalar_lea.hbm (!%p305_p9), %s1701_s9, %s1566_s24 }
  0x13   : > { %1250 = vmatprep.subr.bf16.mxu0 (!%p305_p9), %v1376_v2  ;;  %1270 = vmatprep.subr.bf16.mxu1 (!%p305_p9), %v1393_v4  ;;  %v1174_v25 = vld [vmem:[%s1696_s4] ss:$0 sm:$0xff] (!%p305_p9)  ;;  %s343_s26 = scalar_lea.vmem (!%p305_p9), [#allocation3], %s342_s25  ;;  %s1052_s10 = scalar_lea.sflag (!%p305_p9), [#allocation4], %s342_s25 }
  0x14   : > { %1271 = vmatpush3.bf16.msra.mxu1 (!%p305_p9), %v1393_v4  ;;  %s1464_s15 = smov (!%p305_p9), [#allocation3]  }
  0x15   : > { %1272 = vmatprep.subr.bf16.mxu1 (!%p305_p9), %v1394_v5  ;;  %s1401_s17 = sshll.u32 (!%p305_p9), %s1464_s15, 4  ;;  %s1402_s17 = int_to_ptr.vmem [resolvable:$false] %s1401_s17 }
  0x18   : > { %s346_s27 = scalar_select %p345_p10, %s1566_s24, 31  ;;  %1273 = vmatpush3.bf16.msra.mxu1 %v1394_v5 }
  0x19   : > { %1274 = vmatprep.subr.bf16.mxu1 %v1395_v23 }
  0x1a   : > { %s1136_s8 = sshll.u32 %s346_s27, 2 }
  0x1b   : > { %s354_s18 = scalar_lea.vmem %s1693_s1, %s1136_s8  ;;  %s348_s27 = scalar_lea.vmem %s1692_s0, %s1136_s8 }
  0x1c   : > { %v1375_v7 = vld [vmem:[%s354_s18] sm:$0xff]   ;;  %v1377_v8 = vld [vmem:[%s354_s18 + $0x8] sm:$0xff]   ;;  %v1378_v9 = vld [vmem:[%s354_s18 + $0x10] sm:$0xff]   ;;  %1275 = vmatpush3.bf16.msra.mxu1 %v1395_v23 }
  0x1d   : > { %1234 = vmatprep.mubr.msk.bf16.mxu0 %vm440_vm1, %v1375_v7  ;;  %v1379_v10 = vld [vmem:[%s354_s18 + $0x18] sm:$0xff]   ;;  %v1380_v11 = vld [vmem:[%s354_s18 + $0x20] sm:$0xff]   ;;  %v1382_v12 = vld [vmem:[%s354_s18 + $0x28] sm:$0xff]   ;;  %1276 = vmatprep.subr.bf16.mxu1 %v1396_v24 }
  0x1e   : > { %1235 = vmatmul.mubr.msk.bf16.vlgmr.msra.gmra.mrb[0].mxu0 %vm440_vm1, %v1377_v8  ;;  %v1383_v13 = vld [vmem:[%s354_s18 + $0x30] sm:$0xff]   ;;  %v1384_v14 = vld [vmem:[%s354_s18 + $0x38] sm:$0xff]   ;;  %v1385_v15 = vld [vmem:[%s348_s27] sm:$0xff]   ;;  %s1403_s18 = scalar_lea.vmem %s1402_s17, 32 }
  0x1f   : > { %1251 = vmatpush3.bf16.msra.mxu0 %v1376_v2  ;;  %1238 = vmatprep.mubr.msk.bf16.mxu0 %vm440_vm1, %v1378_v9  ;;  %v1386_v16 = vld [vmem:[%s348_s27 + $0x8] sm:$0xff]   ;;  %v1387_v17 = vld [vmem:[%s348_s27 + $0x10] sm:$0xff]   ;;  %v1388_v18 = vld [vmem:[%s348_s27 + $0x18] sm:$0xff]  }
  0x20   : > { %1252 = vmatprep.subr.bf16.mxu0 %v1381_v6  ;;  %v1389_v19 = vld [vmem:[%s348_s27 + $0x20] sm:$0xff]   ;;  %v1390_v20 = vld [vmem:[%s348_s27 + $0x28] sm:$0xff]   ;;  %v1391_v21 = vld [vmem:[%s348_s27 + $0x30] sm:$0xff]   ;;  %1277 = vmatpush3.bf16.msra.mxu1 %v1396_v24 }
  0x21   : > { %v1392_v22 = vld [vmem:[%s348_s27 + $0x38] sm:$0xff]   ;;  %s1064_s27 = sshll.u32 %s343_s26, 4  ;;  %s1652_s27 = int_to_ptr.vmem [resolvable:$true] %s1064_s27 }
  0x22   : > { %s1397_s8 = scalar_lea.vmem %s1652_s27, 16  ;;  %p1404_p0 = scmp.lt.s32.totalorder %s1652_s27, %s1402_s17 }
  0x23   : > { %1253 = vmatpush3.bf16.msra.mxu0 %v1381_v6  ;;  %p1398_p11 = scmp.ne.s32.totalorder %s1652_s27, %s1397_s8  ;;  %p1405_p1 = scmp.lt.s32.totalorder %s1403_s18, %s1397_s8 }
  0x25   : > { %p1399_p12 = pnand %p1398_p11, %p1553_p5  ;;  %p1406_p2 = por %p1405_p1, %p1404_p0 }
  0x26   : > { %1239 = vmatmul.mubr.msk.bf16.gmra.mrb[4].mxu0 %vm440_vm1, %v1379_v10 }
  0x27   : > { %1242 = vmatprep.mubr.msk.bf16.mxu0 %vm440_vm1, %v1380_v11  ;;  %p1400_p13 = pneg %p1399_p12 }
  0x29   : > { %p1407_p3 = pnand %p1406_p2, %p1400_p13 }
  0x2e   : > { %1243 = vmatmul.mubr.msk.bf16.gmra.mrb[8].mxu0 %vm440_vm1, %v1382_v12 }
  0x2f   : > { %1246 = vmatprep.mubr.msk.bf16.mxu0 %vm440_vm1, %v1383_v13 }
  0x36   : > { %1247 = vmatmul.mubr.msk.bf16.gmra.mrb[12].mxu0 %vm440_vm1, %v1384_v14 }
  0x37   : > { %1254 = vmatprep.mubr.msk.bf16.mxu0 %vm618_vm2, %v1385_v15 }
  0x3e   : > { %1255 = vmatmul.mubr.msk.bf16.vlgmr.msra.gmra.mrb[0].mxu0 %vm618_vm2, %v1386_v16 }
  0x3f   : > { %1258 = vmatprep.mubr.msk.bf16.mxu0 %vm618_vm2, %v1387_v17 }
  0x46   : > { %1259 = vmatmul.mubr.msk.bf16.gmra.mrb[4].mxu0 %vm618_vm2, %v1388_v18  ;;  %v1461_v18 = vmov 0.0  }
  0x47   : > { %1262 = vmatprep.mubr.msk.bf16.mxu0 %vm618_vm2, %v1389_v19  ;;  %1294 = vmatprep.subr.bf16.mxu1 %v1461_v18  ;;  %v973_v19 = vld [vmem:[#allocation2] sm:$0x1] }
  0x4e   : > { %1263 = vmatmul.mubr.msk.bf16.gmra.mrb[8].mxu0 %vm618_vm2, %v1390_v20  ;;  %v1463_v20 = vmov 0  }
  0x4f   : > { %1266 = vmatprep.mubr.msk.bf16.mxu0 %vm618_vm2, %v1391_v21  ;;  %1373 = vset.pattern.permute.xlu0 %v1463_v20  ;;  %v1175_v21 = vld [vmem:[%s1698_s6] ss:$0 sm:$0xff] }
  0x50   : > { %976 = vperm.xlu0 %1373, %v973_v19  }
  0x56   : > { %1267 = vmatmul.mubr.msk.bf16.gmra.mrb[12].mxu0 %vm618_vm2, %v1392_v22 }
 0x111   : > { %v1256_v26 = vpop.f32.mrb[0].mxu0 }
 0x112   : > { %v749_v27 = vadd.f32 %v1256_v26, %v1174_v25  ;;  %v677_v28 = vpop.f32.mrb[1].mxu0 }
 0x113   : > { %v747_v29 = vadd.f32 %v1174_v25, %v677_v28  ;;  %v1257_v30 = vpop.f32.mrb[2].mxu0 }
 0x114   : > { %v750_v31 = vadd.f32 %v1257_v30, %v1174_v25  ;;  %v680_v32 = vpop.f32.mrb[3].mxu0  ;;  %v765_v34 = vmax.f32 %v749_v27, 0.0 }
 0x115   : > { %v748_v33 = vadd.f32 %v1174_v25, %v680_v32  ;;  %v763_v36 = vmax.f32 %v747_v29, 0.0 }
 0x116   : > { %v766_v35 = vmax.f32 %v750_v31, 0.0 }
 0x117   : > { %v764_v37 = vmax.f32 %v748_v33, 0.0 }
 0x118   : > { %v780_v38 = vpack.c.bf16 %v766_v35, %v765_v34 }
 0x119   : > { %v1260_v39 = vpop.f32.mrb[4].mxu0  ;;  %v779_v40 = vpack.c.bf16 %v764_v37, %v763_v36 }
 0x11a   : > { %v753_v41 = vadd.f32 %v1260_v39, %v1174_v25  ;;  %v693_v42 = vpop.f32.mrb[5].mxu0 }
 0x11b   : > { %v751_v43 = vadd.f32 %v1174_v25, %v693_v42  ;;  %v1261_v44 = vpop.f32.mrb[6].mxu0  ;;  %1278 = vmatprep.mubr.msk.bf16.mxu1 %vm826_vm3, %v779_v40 }
 0x11c   : > { %v754_v45 = vadd.f32 %v1261_v44, %v1174_v25  ;;  %v696_v46 = vpop.f32.mrb[7].mxu0  ;;  %1279 = vmatmul.mubr.msk.bf16.vlgmr.msra.gmra.mrb[0].mxu1 %vm826_vm3, %v780_v38  ;;  %v769_v48 = vmax.f32 %v753_v41, 0.0 }
 0x11d   : > { %v752_v47 = vadd.f32 %v1174_v25, %v696_v46  ;;  %v767_v50 = vmax.f32 %v751_v43, 0.0 }
 0x11e   : > { %v770_v49 = vmax.f32 %v754_v45, 0.0 }
 0x11f   : > { %v768_v51 = vmax.f32 %v752_v47, 0.0 }
 0x120   : > { %v782_v52 = vpack.c.bf16 %v770_v49, %v769_v48 }
 0x121   : > { %v781_v53 = vpack.c.bf16 %v768_v51, %v767_v50  ;;  %v1264_v54 = vpop.f32.mrb[8].mxu0 }
 0x122   : > { %v757_v55 = vadd.f32 %v1264_v54, %v1174_v25  ;;  %v709_v56 = vpop.f32.mrb[9].mxu0 }
 0x123   : > { %v755_v57 = vadd.f32 %v1174_v25, %v709_v56  ;;  %v1265_v58 = vpop.f32.mrb[10].mxu0  ;;  %1282 = vmatprep.mubr.msk.bf16.mxu1 %vm826_vm3, %v781_v53 }
 0x124   : > { %v758_v59 = vadd.f32 %v1265_v58, %v1174_v25  ;;  %v712_v60 = vpop.f32.mrb[11].mxu0  ;;  %1283 = vmatmul.mubr.msk.bf16.gmra.mrb[4].mxu1 %vm826_vm3, %v782_v52  ;;  %v773_v62 = vmax.f32 %v757_v55, 0.0 }
 0x125   : > { %v756_v61 = vadd.f32 %v1174_v25, %v712_v60  ;;  %v771_v0 = vmax.f32 %v755_v57, 0.0 }
 0x126   : > { %v774_v63 = vmax.f32 %v758_v59, 0.0 }
 0x127   : > { %v772_v1 = vmax.f32 %v756_v61, 0.0 }
 0x128   : > { %v784_v2 = vpack.c.bf16 %v774_v63, %v773_v62 }
 0x129   : > { %v783_v3 = vpack.c.bf16 %v772_v1, %v771_v0  ;;  %v1268_v4 = vpop.f32.mrb[12].mxu0 }
 0x12a   : > { %v761_v5 = vadd.f32 %v1268_v4, %v1174_v25  ;;  %v725_v6 = vpop.f32.mrb[13].mxu0 }
 0x12b   : > { %v759_v7 = vadd.f32 %v1174_v25, %v725_v6  ;;  %v1269_v8 = vpop.f32.mrb[14].mxu0  ;;  %1286 = vmatprep.mubr.msk.bf16.mxu1 %vm826_vm3, %v783_v3 }
 0x12c   : > { %v762_v9 = vadd.f32 %v1269_v8, %v1174_v25  ;;  %v728_v10 = vpop.f32.mrb[15].mxu0  ;;  %1287 = vmatmul.mubr.msk.bf16.gmra.mrb[8].mxu1 %vm826_vm3, %v784_v2  ;;  %v777_v12 = vmax.f32 %v761_v5, 0.0 }
 0x12d   : > { %v760_v11 = vadd.f32 %v1174_v25, %v728_v10  ;;  %v775_v14 = vmax.f32 %v759_v7, 0.0 }
 0x12e   : > { %v778_v13 = vmax.f32 %v762_v9, 0.0 }
 0x12f   : > { %v776_v15 = vmax.f32 %v760_v11, 0.0 }
 0x130   : > { %v786_v16 = vpack.c.bf16 %v778_v13, %v777_v12 }
 0x131   : > { %v785_v17 = vpack.c.bf16 %v776_v15, %v775_v14 }
 0x133   : > { %1290 = vmatprep.mubr.msk.bf16.mxu1 %vm826_vm3, %v785_v17 }
 0x134   : > { %1291 = vmatmul.mubr.msk.bf16.gmra.mrb[12].mxu1 %vm826_vm3, %v786_v16 }
 0x135   : > { %1310 = vmatprep.mubr.msk.bf16.mxu1 %vm1462_vm4, %v1461_v18 }
 0x1ef   : > { %v1280_v22 = vpop.f32.mrb[0].mxu1 }
 0x1f0   : > { %v894_v23 = vadd.f32 %v1280_v22, %v1175_v21  ;;  %v885_v24 = vpop.f32.mrb[1].mxu1 }
 0x1f1   : > { %v886_v25 = vadd.f32 %v1175_v21, %v885_v24  ;;  %v1281_v26 = vpop.f32.mrb[2].mxu1  ;;  %v979_v24 = vlaneseq }
 0x1f2   : > { %v897_v27 = vadd.f32 %v1281_v26, %v1175_v21  ;;  %v888_v28 = vpop.f32.mrb[3].mxu1  ;;  %v950_v30 = vmax.f32 %v894_v23, 0.0  ;;  %v964_v23 = vld [vmem:[%s1699_s7] sm:$0x1] }
 0x1f3   : > { %v889_v29 = vadd.f32 %v1175_v21, %v888_v28  ;;  %v948_v32 = vmax.f32 %v886_v25, 0.0  ;;  %v980_v25 = vshrl.u32 %v979_v24, 7 }
 0x1f4   : > { %v951_v31 = vmax.f32 %v897_v27, 0.0  ;;  %v977_v27 = vpop.permute.xlu0 %976 }
 0x1f5   : > { %v949_v33 = vmax.f32 %v889_v29, 0.0  ;;  %v981_v26 = vsub.s32 0, %v980_v25 }
 0x1f6   : > { %v966_v34 = vpack.c.bf16 %v951_v31, %v950_v30 }
 0x1f7   : > { %v965_v35 = vpack.c.bf16 %v949_v33, %v948_v32  ;;  %v1284_v36 = vpop.f32.mrb[4].mxu1  ;;  %v982_v28 = vrot.slane %v977_v27, %v981_v26 }
 0x1f8   : > { %v910_v37 = vadd.f32 %v1284_v36, %v1175_v21  ;;  %v901_v38 = vpop.f32.mrb[5].mxu1  ;;  %v990_v56 = vsel %vm826_vm3, %v966_v34, 0 }
 0x1f9   : > { %v902_v39 = vadd.f32 %v1175_v21, %v901_v38  ;;  %v1285_v40 = vpop.f32.mrb[6].mxu1  ;;  %v987_v41 = vsel %vm826_vm3, %v965_v35, 0 }
 0x1fa   : > { %v913_v42 = vadd.f32 %v1285_v40, %v1175_v21  ;;  %v904_v43 = vpop.f32.mrb[7].mxu1  ;;  %1295 = vmatpush3.bf16.xpose.msra.mxu1 %v987_v41  ;;  %v954_v45 = vmax.f32 %v910_v37, 0.0 }
 0x1fb   : > { %v905_v44 = vadd.f32 %v1175_v21, %v904_v43  ;;  %1296 = vmatprep.subr.bf16.mxu1 %v1461_v18  ;;  %v952_v47 = vmax.f32 %v902_v39, 0.0 }
 0x1fc   : > { %v955_v46 = vmax.f32 %v913_v42, 0.0 }
 0x1fd   : > { %v953_v48 = vmax.f32 %v905_v44, 0.0 }
 0x1fe   : > { %v968_v49 = vpack.c.bf16 %v955_v46, %v954_v45 }
 0x1ff   : > { %v967_v50 = vpack.c.bf16 %v953_v48, %v952_v47  ;;  %v1288_v51 = vpop.f32.mrb[8].mxu1 }
 0x200   : > { %v926_v52 = vadd.f32 %v1288_v51, %v1175_v21  ;;  %v917_v53 = vpop.f32.mrb[9].mxu1  ;;  %v996_v17 = vsel %vm826_vm3, %v968_v49, 0 }
 0x201   : > { %v918_v54 = vadd.f32 %v1175_v21, %v917_v53  ;;  %v1289_v55 = vpop.f32.mrb[10].mxu1  ;;  %v993_v7 = vsel %vm826_vm3, %v967_v50, 0 }
 0x202   : > { %v929_v57 = vadd.f32 %v1289_v55, %v1175_v21  ;;  %v920_v58 = vpop.f32.mrb[11].mxu1  ;;  %1297 = vmatpush3.bf16.xpose.msra.mxu1 %v990_v56  ;;  %v958_v60 = vmax.f32 %v926_v52, 0.0 }
 0x203   : > { %v921_v59 = vadd.f32 %v1175_v21, %v920_v58  ;;  %1298 = vmatprep.subr.bf16.mxu1 %v1461_v18  ;;  %v956_v62 = vmax.f32 %v918_v54, 0.0 }
 0x204   : > { %v959_v61 = vmax.f32 %v929_v57, 0.0 }
 0x205   : > { %v957_v63 = vmax.f32 %v921_v59, 0.0 }
 0x206   : > { %v970_v0 = vpack.c.bf16 %v959_v61, %v958_v60 }
 0x207   : > { %v969_v1 = vpack.c.bf16 %v957_v63, %v956_v62  ;;  %v1292_v2 = vpop.f32.mrb[12].mxu1 }
 0x208   : > { %v942_v3 = vadd.f32 %v1292_v2, %v1175_v21  ;;  %v933_v4 = vpop.f32.mrb[13].mxu1  ;;  %v1002_v20 = vsel %vm826_vm3, %v970_v0, 0 }
 0x209   : > { %v934_v5 = vadd.f32 %v1175_v21, %v933_v4  ;;  %v1293_v6 = vpop.f32.mrb[14].mxu1  ;;  %v999_v19 = vsel %vm826_vm3, %v969_v1, 0 }
 0x20a   : > { %v945_v8 = vadd.f32 %v1293_v6, %v1175_v21  ;;  %v936_v9 = vpop.f32.mrb[15].mxu1  ;;  %1299 = vmatpush3.bf16.xpose.msra.mxu1 %v993_v7  ;;  %v962_v11 = vmax.f32 %v942_v3, 0.0 }
 0x20b   : > { %v937_v10 = vadd.f32 %v1175_v21, %v936_v9  ;;  %1300 = vmatprep.subr.bf16.mxu1 %v1461_v18  ;;  %v960_v13 = vmax.f32 %v934_v5, 0.0 }
 0x20c   : > { %v963_v12 = vmax.f32 %v945_v8, 0.0 }
 0x20d   : > { %v961_v14 = vmax.f32 %v937_v10, 0.0 }
 0x20e   : > { %v972_v15 = vpack.c.bf16 %v963_v12, %v962_v11 }
 0x20f   : > { %v971_v16 = vpack.c.bf16 %v961_v14, %v960_v13 }
 0x210   : > { %v1008_v22 = vsel %vm826_vm3, %v972_v15, 0 }
 0x211   : > { %v1005_v21 = vsel %vm826_vm3, %v971_v16, 0 }
 0x212   : > { %1301 = vmatpush3.bf16.xpose.msra.mxu1 %v996_v17 }
 0x213   : > { %1302 = vmatprep.subr.bf16.mxu1 %v1461_v18 }
 0x21a   : > { %1303 = vmatpush3.bf16.xpose.msra.mxu1 %v999_v19 }
 0x21b   : > { %1304 = vmatprep.subr.bf16.mxu1 %v1461_v18 }
 0x222   : > { %1305 = vmatpush3.bf16.xpose.msra.mxu1 %v1002_v20 }
 0x223   : > { %1306 = vmatprep.subr.bf16.mxu1 %v1461_v18 }
 0x22a   : > { %1307 = vmatpush3.bf16.xpose.msra.mxu1 %v1005_v21 }
 0x22b   : > { %1308 = vmatprep.subr.bf16.mxu1 %v1461_v18 }
 0x232   : > { %1309 = vmatpush3.bf16.xpose.msra.mxu1 %v1008_v22 }
 0x239   : > { %1311 = vmatmul.mubr.msk.bf16.vlgmr.msra.gmra.mrb[16].mxu1 %vm826_vm3, %v964_v23 }
 0x30c   : > { %v1044_v18 = vpop.f32.mrb[16].mxu1 }
 0x30d   : > { %v1045_v29 = vadd.f32 %v1044_v18, %v982_v28  ;;  %v1312_v30 = vpop.f32.mrb[17].mxu1 }
 0x30e   : > { %v1047_v31 = vpop.f32.mrb[18].mxu1 }
 0x30f   : > { %1050 = vst [vmem:[%s343_s26] sm:$0x1] %v1045_v29  ;;  %v1313_v32 = vpop.f32.mrb[19].mxu1 }
 0x310   : > { %1410 = shalt.err (!%p1407_p3)
}
 0x311   : > { %s1411_s24 = scalar_lea.hbm %s1650_s30, 16  ;;  %s1415_s25 = scalar_lea.hbm %s1701_s9, 32 }
 0x312   : > { %p1412_p4 = scmp.ne.s32.totalorder %s1650_s30, %s1411_s24  ;;  %p1416_p9 = scmp.lt.u32.totalorder %s1650_s30, %s1701_s9 }
 0x313   : > { %p1417_p10 = scmp.lt.u32.totalorder %s1415_s25, %s1411_s24  ;;  %p1419_p12 = scmp.lt.u32.totalorder %s1411_s24, %s1650_s30 }
 0x314   : > { %p1413_p7 = pnand %p1412_p4, %p1553_p5 }
 0x315   : > { %p1418_p11 = por %p1417_p10, %p1416_p9 }
 0x316   : > { %p1414_p8 = pneg %p1413_p7 }
 0x317   : > { %p1420_p13 = por %p1419_p12, %p1418_p11 }
 0x319   : > { %p1421_p0 = pnand %p1420_p13, %p1414_p8 }
 0x31b   : > { %1424 = shalt.err (!%p1421_p0)
}
 0x31c   : > { %1331 = dma.vmem_to_hbm [thread:$0]  (%p1553_p5), %s1652_s27, 16, %s1650_s30, %s1052_s10  }
 0x31d PF: > { %p1337_p1 = scmp.ge.s32.totalorder %s1459_s14, 2  ;;  %s1076_s29 = sand.u32 1, %s1447_s11  }
 0x31e   : > { %s1077_s8 = scalar_lea.sflag [#allocation4], %s1076_s29 }
 0x31f   : > { %p1334_p2 = pnand %p1337_p1, %p1557_p6 }
 0x321   : > { %1442 = dma.done.wait (!%p1334_p2), %s1077_s8, 16  }
 0x322   : > { %1444 = vsyncadd (!%p1334_p2), %s1077_s8, 4294967280  ;;  %p21_p3 = scmp.ge.s32.totalorder %s1541_s16, 4   ;;  %s1704_s11 = smov %s1451_s12 }
 0x323   : > { %s1705_s12 = smov %s1455_s13  ;;  %s1706_s13 = smov %s1551_s19 }
 0x324   : > { %s1707_s14 = smov %s1541_s16  ;;  %23 = sbr.rel (!%p21_p3) target bundleno = 6 (0x6), region = 94 }
 0x32b   :  { %1081 = vsyncpa [#allocation4], 1 }
 0x32c   :  { %1083 = vsyncpa [#allocation4 + $0x1], 1 }

</bundles_post_ra>
